<compile_context>
chip_gen: v5e
topology: v5e:2x2
jax: 0.10.0
libtpu: 0.0.40
codegen_flags: <defaults>
</compile_context>

<pallas_src>
import jax
import jax.numpy as jnp
from jax.experimental import pallas as pl
from jax.experimental.pallas import tpu as pltpu


_MEAN = (0.485, 0.456, 0.406)
_STD = (0.229, 0.224, 0.225)


def _normalizer_kernel(scale_ref, bias_ref, x_ref, o_ref):
    # scale_ref / bias_ref: (TILE_R, 1) per-row affine coefficients (VMEM)
    # x_ref:                (TILE_R, TILE_L) tile in the input's native dtype
    # o_ref:                (TILE_R, TILE_L) float32 output tile
    x = x_ref[...].astype(jnp.float32)          # cast in-kernel (free on VPU)
    o_ref[...] = x * scale_ref[...] + bias_ref[...]
    # NOTE: could store bf16 here to halve write traffic, but that changes the
    # module's output dtype, so we keep f32.


def _target_bytes_and_vmem_limit():
    """Generation-aware tile budget (bytes of the f32 output tile)."""
    try:
        vmem_cap = pltpu.get_tpu_info().vmem_capacity_bytes
    except Exception:
        vmem_cap = 128 * 1024 * 1024
    if vmem_cap <= 80 * 1024 * 1024:
        # v7x-class: 64 MiB VMEM but ~3.2 TB/s HBM per TC -> bigger tiles to
        # amortize the ~0.35 us per-step cost. 2 in + 2 out bufs of ~6 MiB
        # is ~24 MiB, comfortably under the 40 MiB limit we request.
        return 6 * 1024 * 1024, 40 * 1024 * 1024
    # v5e / v6e: 128 MiB physical VMEM; 4 MiB tiles keep step overhead tiny.
    return 4 * 1024 * 1024, 48 * 1024 * 1024


def _choose_tiles(R, L, in_bytes, target_bytes):
    """Pick a layout-legal, lane-dense tile for the (R, L) view.

    Never falls back to full-extent L (or full-extent huge R): ragged shapes
    are handled by Pallas partial edge blocks, so VMEM usage stays bounded.
    """
    # Minimum sublane granularity for the packed input dtype:
    # f32 -> 8, bf16/f16 -> 16, u8/i8 -> 32.
    sub_min = max(8, 32 // in_bytes)

    # Row (sublane) tile. R = N*C is tiny in practice; keep it fully resident
    # so scale/bias never get re-fetched and the grid is effectively 1-D over
    # the big spatial axis. For pathological huge R, tile in sub_min multiples
    # and let the ragged edge be a partial block.
    R_CAP = 1024
    if R <= R_CAP:
        tile_r = R                                   # full extent: always legal
    else:
        tile_r = min(R_CAP, (R // sub_min) * sub_min)

    # Lane tile: a multiple of 128 sized so the f32 output tile is about
    # target_bytes. Ragged L -> partial edge block (never tile_l = L).
    if L < 128:
        tile_l = L                                   # full extent
    else:
        budget = max(128, (target_bytes // (tile_r * 4)) // 128 * 128)
        tile_l = min(budget, (L // 128) * 128)
    return tile_r, tile_l


def _affine_coeffs(N, C):
    """Per-(n, c) scale/bias implementing the PyTorch forward."""
    mean = jnp.array(_MEAN, dtype=jnp.float32)
    std = jnp.array(_STD, dtype=jnp.float32)
    scale = jnp.full((N, C), 1.0 / 255.0, dtype=jnp.float32)
    bias = jnp.zeros((N, C), dtype=jnp.float32)
    # TODO(synk): PyTorch loops range(3) unconditionally and would error for
    # C < 3; we clamp to the available channels instead.
    nch = min(3, C)
    scale = scale.at[0, :nch].set(1.0 / (255.0 * std[:nch]))
    bias = bias.at[0, :nch].set(-mean[:nch] / std[:nch])
    return scale.reshape(N * C, 1), bias.reshape(N * C, 1)


def normalizer_forward(x, *, force_pallas=False):
    """x: [N, C, H, W] (NCHW), any image-ish dtype. Returns float32 tensor."""
    N, C, H, W = x.shape
    # Keep x in its native dtype (uint8 images move 1 B/elem over HBM); the
    # float cast happens inside the kernel. Unsupported dtypes fall back to f32.
    if x.dtype not in (jnp.uint8, jnp.int8, jnp.int32,
                       jnp.bfloat16, jnp.float16, jnp.float32):
        x = x.astype(jnp.float32)

    R, L = N * C, H * W
    scale, bias = _affine_coeffs(N, C)

    # Small-input fast path: fixed pallas_call/pipeline setup cost dominates
    # for tiny tensors; a fused XLA elementwise op is faster there.
    if x.size <= 16 * 1024 and not force_pallas:
        x2 = x.reshape(R, L).astype(jnp.float32)
        return (x2 * scale + bias).reshape(N, C, H, W)

    x2 = x.reshape(R, L)                    # lane-dense view: plane -> lanes
    in_bytes = x.dtype.itemsize
    target_bytes, vmem_limit = _target_bytes_and_vmem_limit()
    tile_r, tile_l = _choose_tiles(R, L, in_bytes, target_bytes)

    # L-tile axis FIRST so megacore (v7x: 2 TCs) shards the large axis even
    # when the R axis has a single block (the common case, R = N*C tiny).
    grid = (pl.cdiv(L, tile_l), pl.cdiv(R, tile_r))

    out2 = pl.pallas_call(
        _normalizer_kernel,
        out_shape=jax.ShapeDtypeStruct((R, L), jnp.float32),
        grid_spec=pltpu.PrefetchScalarGridSpec(
            num_scalar_prefetch=0,
            grid=grid,
            in_specs=[
                # scale/bias: constant block across the (fast) L axis -> stays
                # VMEM-resident through the steady-state loop.
                pl.BlockSpec((tile_r, 1), lambda j, i: (i, 0)),        # scale
                pl.BlockSpec((tile_r, 1), lambda j, i: (i, 0)),        # bias
                pl.BlockSpec((tile_r, tile_l), lambda j, i: (i, j)),   # x
            ],
            out_specs=pl.BlockSpec((tile_r, tile_l), lambda j, i: (i, j)),
        ),
        compiler_params=pltpu.CompilerParams(
            dimension_semantics=("parallel", "parallel"),
            vmem_limit_bytes=vmem_limit,
        ),
        cost_estimate=pl.CostEstimate(
            flops=2 * R * L,
            transcendentals=0,
            bytes_accessed=R * L * (in_bytes + 4),
        ),
        # NOTE: if the caller donates an f32 x, input_output_aliases={2: 0}
        # would reuse its HBM buffer; omitted because the tests reuse x.
    )(scale, bias, x2)

    return out2.reshape(N, C, H, W)


def _reference(x):
    # Pure-JAX reference of the PyTorch forward.
    t = x.astype(jnp.float32) / 255.0
    mean = jnp.array(_MEAN, dtype=jnp.float32)
    std = jnp.array(_STD, dtype=jnp.float32)
    nch = min(3, x.shape[1])
    t = t.at[0, :nch].set((t[0, :nch] - mean[:nch, None, None])
                          / std[:nch, None, None])
    return t


if __name__ == "__main__":
    key = jax.random.PRNGKey(0)
    k1, k2, k3 = jax.random.split(key, 3)

    # 1) Tiny input (the canonical small shape): exercises the XLA fast path.
    x_small = jax.random.uniform(k1, (2, 3, 16, 16), jnp.float32, 0.0, 255.0)
    out_small = jax.block_until_ready(normalizer_forward(x_small))
    ref_small = _reference(x_small)
    assert out_small.shape == ref_small.shape and out_small.dtype == jnp.float32
    assert float(jnp.max(jnp.abs(out_small - ref_small))) < 1e-5

    # 2) f32 input with a ragged spatial plane (L = 5600, not a multiple of
    #    128): exercises the Pallas path with partial edge blocks.
    x_f32 = jax.random.uniform(k2, (2, 4, 56, 100), jnp.float32, 0.0, 255.0)
    out_f32 = jax.block_until_ready(normalizer_forward(x_f32))
    ref_f32 = _reference(x_f32)
    assert out_f32.dtype == jnp.float32
    assert float(jnp.max(jnp.abs(out_f32 - ref_f32))) < 1e-5

    # 3) uint8 image input: exercises the in-kernel dtype cast (1 B/elem read).
    x_u8 = jax.random.randint(k3, (2, 4, 32, 128), 0, 256,
                              dtype=jnp.int32).astype(jnp.uint8)
    out_u8 = jax.block_until_ready(normalizer_forward(x_u8))
    ref_u8 = _reference(x_u8)
    assert out_u8.dtype == jnp.float32
    assert float(jnp.max(jnp.abs(out_u8 - ref_u8))) < 1e-5

    print("KERNEL_OK")
</pallas_src>

<mosaic_0001>
module attributes {stable_mosaic.version = 11 : i64} {
  func.func @_normalizer_kernel(%arg0: i32, %arg1: i32, %arg2: memref<8x1xf32, #tpu.memory_space<vmem>>, %arg3: memref<8x1xf32, #tpu.memory_space<vmem>>, %arg4: memref<8x5504xf32, #tpu.memory_space<vmem>>, %arg5: memref<8x5504xf32, #tpu.memory_space<vmem>>) attributes {dimension_semantics = [#tpu.dimension_semantics<parallel>, #tpu.dimension_semantics<parallel>], iteration_bounds = array<i64: 2, 1>, scalar_prefetch = 0 : i64, scratch_operands = 0 : i64, tpu.core_type = #tpu.core_type<tc>, window_params = [{transform_indices = @transform_0, window_bounds = array<i64: 8, 1>}, {transform_indices = @transform_1, window_bounds = array<i64: 8, 1>}, {transform_indices = @transform_2, window_bounds = array<i64: 8, 5504>}, {transform_indices = @transform_3, window_bounds = array<i64: 8, 5504>}]} {
    %c0 = arith.constant 0 : index
    %c0_0 = arith.constant 0 : index
    %0 = vector.load %arg4[%c0, %c0_0] : memref<8x5504xf32, #tpu.memory_space<vmem>>, vector<8x5504xf32>
    %c0_1 = arith.constant 0 : index
    %c0_2 = arith.constant 0 : index
    %1 = vector.load %arg2[%c0_1, %c0_2] : memref<8x1xf32, #tpu.memory_space<vmem>>, vector<8x1xf32>
    %2 = vector.broadcast %1 : vector<8x1xf32> to vector<8x5504xf32>
    %3 = arith.mulf %0, %2 : vector<8x5504xf32>
    %c0_3 = arith.constant 0 : index
    %c0_4 = arith.constant 0 : index
    %4 = vector.load %arg3[%c0_3, %c0_4] : memref<8x1xf32, #tpu.memory_space<vmem>>, vector<8x1xf32>
    %5 = vector.broadcast %4 : vector<8x1xf32> to vector<8x5504xf32>
    %6 = arith.addf %3, %5 : vector<8x5504xf32>
    %c0_5 = arith.constant 0 : index
    %c0_6 = arith.constant 0 : index
    %7 = vector.load %arg5[%c0_5, %c0_6] : memref<8x5504xf32, #tpu.memory_space<vmem>>, vector<8x5504xf32>
    tpu.vector_store %arg5[%c0_5, %c0_6], %6 {strides = array<i32>} : memref<8x5504xf32, #tpu.memory_space<vmem>>, vector<8x5504xf32>,
    return
  }
  func.func @transform_0(%arg0: i32, %arg1: i32) -> (i32, i32) {
    %c0_i32 = arith.constant 0 : i32
    %c0_i32_0 = arith.constant 0 : i32
    return %arg1, %c0_i32 : i32, i32
  }
  func.func @transform_1(%arg0: i32, %arg1: i32) -> (i32, i32) {
    %c0_i32 = arith.constant 0 : i32
    %c0_i32_0 = arith.constant 0 : i32
    return %arg1, %c0_i32 : i32, i32
  }
  func.func @transform_2(%arg0: i32, %arg1: i32) -> (i32, i32) {
    %c0_i32 = arith.constant 0 : i32
    return %arg1, %arg0 : i32, i32
  }
  func.func @transform_3(%arg0: i32, %arg1: i32) -> (i32, i32) {
    %c0_i32 = arith.constant 0 : i32
    return %arg1, %arg0 : i32, i32
  }
}

</mosaic_0001>

<bundles_post_ra>
// kernel: tpu_custom_call.1
= control target key start
LH: loop header
LB: loop body
LE: loop exit
PB: predicated region body
PF: predicated region fallthrough
CT: control target
= control target key end

     0   :  { %8 = vsyncpa [#allocation3], 0  ;;  %s1179_s0 = inlined_call_operand.vmem [shape: f32[8,1], index: 0, kind: input, shape index: {}]   ;;  %s1180_s1 = inlined_call_operand.vmem [shape: f32[8,1], index: 1, kind: input, shape index: {}]   ;;  %s1181_s2 = inlined_call_operand.hbm [shape: f32[8,5600], index: 2, kind: input, shape index: {}]   ;;  %s1182_s3 = inlined_call_operand.hbm [shape: f32[8,5600], index: 3, kind: output, shape index: {}]  }
   0x1   :  { %10 = vsyncpa [#allocation3 + $0x1], 0 }
   0x2   :  { %11 = vsyncpa [#allocation4], 0 }
   0x3   :  { %13 = vsyncpa [#allocation4 + $0x1], 0  ;;  %s819_s12 = smov 0   ;;  %s821_s13 = smov 0  }
   0x4   :  { %s823_s14 = smov 0   ;;  %s825_s15 = smov 0  }
   0x5   :  { %s827_s16 = smov 0   ;;  %s829_s17 = smov 0  }
   0x6 LB: > { %s582_s18 = sadd.s32 4294967295, %s794_s17   ;;  %s583_s19 = sadd.s32 4294967294, %s794_s17   ;;  %s794_s17 = sphi %s829_s17, %s19_s17   ;;  %s790_s16 = sphi %s827_s16, %s1192_s16   ;;  %s786_s15 = sphi %s825_s15, %s1191_s15   ;;  %s782_s14 = sphi %s823_s14, %s1190_s14   ;;  %s778_s13 = sphi %s821_s13, %s1189_s13   ;;  %s774_s12 = sphi %s819_s12, %s1188_s12  }
   0x7   : > { %s31_s20 = sadd.s32 1, %s790_s16  ;;  %s92_s21 = sadd.s32 1, %s782_s14 }
   0x8   : > { %p33_p0 = scmp.ge.s32.totalorder %s31_s20, 2  ;;  %p99_p1 = scmp.ne.s32.totalorder %s782_s14, %s778_s13 }
   0x9   : > { %p100_p2 = scmp.eq.s32.totalorder %s794_s17, 0  ;;  %p105_p3 = scmp.ne.s32.totalorder %s778_s13, %s774_s12 }
   0xa   : > { %s1194_s20 = smov (%p33_p0, %s31_s20), 0  ;;  %p106_p5 = scmp.eq.s32.totalorder %s582_s18, 0 }
   0xb   : > { %p101_p4 = por %p100_p2, %p99_p1  ;;  %s88_s22 = ssub.s32 %s790_s16, %s1194_s20 }
   0xc   : > { %p131_p6 = scmp.eq.s32.totalorder %s582_s18, 1  ;;  %p90_p7 = scmp.eq.s32.totalorder %s88_s22, 0 }
   0xd   : > { %p862_p8 = por %p106_p5, %p105_p3  ;;  %p137_p10 = scmp.eq.s32.totalorder %s583_s19, 1 }
   0xe   : > { %p866_p9 = por %p131_p6, %p99_p1  ;;  %p587_p12 = scmp.ge.s32.totalorder %s794_s17, 2 }
   0xf   : > { %s871_s25 = scalar_select %p90_p7, %s782_s14, %s92_s21  }
  0x10   : > { %p873_p11 = por %p137_p10, %p105_p3  ;;  %167 = sbr.rel (%p587_p12) target bundleno = 58 (0x3a), region = 24 }
  0x15   : > { %170 = sbr.rel (!%p101_p4) target bundleno = 58 (0x3a), region = 28  ;;  %s171_s27 = sand.u32 (%p101_p4), 1, %s782_s14  }
  0x16   : > { %s176_s28 = smul.u32 (%p101_p4), 43, %s790_s16  ;;  %s885_s7 = scalar_lea.sflag (%p101_p4), [#allocation3], %s171_s27 }
  0x17   : > { %s603_s29 = smul.u32 (%p101_p4), 344, %s171_s27 }
  0x18   : > { %s177_s30 = ssub.s32 (%p101_p4), 44, %s176_s28 }
  0x19   : > { %p178_p13 = scmp.lt.s32.totalorder (%p101_p4), %s177_s30, 43  ;;  %s175_s8 = scalar_lea.vmem (%p101_p4), [#allocation2], %s603_s29 }
  0x1b   : > { %s1196_s30 = smov (!%p178_p13, %s177_s30), 43 }
  0x1c   : > { %s588_s4 = sshll.u32 %s1196_s30, 3 }
  0x1d   : > { %s181_s5 = ssub.s32 344, %s588_s4 }
  0x1e   : > { %s182_s6 = sshll.u32 %s181_s5, 4 }
  0x1f   : > { %183 = vsyncadd %s885_s7, %s182_s6  ;;  %p888_p0 = scmp.ne.s32.totalorder %s588_s4, 0  ;;  %s601_s10 = smul.u32 344, %s790_s16 }
  0x20   : > { %s592_s11 = sshll.u32 %s1196_s30, 7  ;;  %s894_s18 = sshll.u32 %s175_s8, 4  ;;  %s194_s18 = int_to_ptr.vmem [resolvable:$true] %s894_s18 }
  0x21   : > { %s188_s22 = scalar_lea.hbm %s1181_s2, %s601_s10  ;;  %s664_s29 = sshrl.u32 %s592_s11, 4 }
  0x22   : > { %s191_s27 = sshll.u32 %s188_s22, 4  ;;  %s673_s8 = scalar_lea.hbm %s1181_s2, 352  ;;  %s192_s27 = int_to_ptr.hbm [resolvable:$true] %s191_s27 }
  0x23   : > { %s662_s28 = sshra.s32 %s192_s27, 4  ;;  %s663_s28 = int_to_ptr.hbm [resolvable:$true] %s662_s28 }
  0x24   : > { %s669_s4 = scalar_lea.hbm %s663_s28, %s664_s29 }
  0x25   : > { %p670_p1 = scmp.ne.s32.totalorder %s663_s28, %s669_s4  ;;  %p675_p4 = scmp.lt.s32.totalorder %s673_s8, %s669_s4 }
  0x27   : > { %p671_p2 = pnand %p670_p1, %p888_p0 }
  0x29   : > { %p672_p3 = pneg %p671_p2 }
  0x2b   : > { %p677_p5 = pnand %p675_p4, %p672_p3 }
  0x2d   : > { %680 = shalt.err (!%p677_p5)
}
  0x2e   : > { %s681_s10 = sshra.s32 %s194_s18, 4  ;;  %s796_s21 = smov [#allocation2]   ;;  %s682_s10 = int_to_ptr.vmem [resolvable:$true] %s681_s10 }
  0x2f   : > { %s688_s19 = scalar_lea.vmem %s682_s10, %s664_s29  ;;  %s692_s22 = scalar_lea.vmem %s796_s21, 688 }
  0x30   : > { %p689_p6 = scmp.ne.s32.totalorder %s682_s10, %s688_s19  ;;  %p694_p13 = scmp.lt.s32.totalorder %s692_s22, %s688_s19 }
  0x32   : > { %p690_p7 = pnand %p689_p6, %p888_p0 }
  0x34   : > { %p691_p10 = pneg %p690_p7 }
  0x36   : > { %p696_p1 = pnand %p694_p13, %p691_p10 }
  0x38   : > { %699 = shalt.err (!%p696_p1)
}
  0x39   : > { %196 = dma.hbm_to_vmem [thread:$0]  (%p888_p0), %s192_s27, %s592_s11, %s194_s18, %s885_s7  }
  0x3a PF: > { %p593_p2 = scmp.ge.s32.totalorder %s794_s17, 1  ;;  %p198_p3 = scmp.lt.s32.totalorder %s794_s17, 3 }
  0x3c   : > { %p199_p4 = pnand %p593_p2, %p198_p3 }
  0x3d   : > { %s917_s28 = sand.u32 (!%p199_p4), 1, %s778_s13  }
  0x3e   : > { %202 = sbr.rel (%p199_p4) target bundleno = 268 (0x10c), region = 32  ;;  %s205_s29 = scalar_lea.sflag (!%p199_p4), [#allocation3], %s917_s28 }
  0x3f   : > { %s604_s9 = smul.u32 (!%p199_p4), 344, %s917_s28 }
  0x41   : > { %s923_s30 = scalar_lea.vmem (!%p199_p4), [#allocation2], %s604_s9 }
  0x43   : > { %765 = dma.done.wait (%p862_p8), %s205_s29, 5504  }
  0x44   : > { %767 = vsyncadd (%p862_p8), %s205_s29, 4294961792  ;;  %v797_v0 = vmov 0   ;;  %v301_v1 = vld [vmem:[%s1179_s0] sm:$0xff]  ;;  %v260_v6 = vld [vmem:[%s923_s30 + $0x10] sm:$0xff]  ;;  %s963_s23 = scalar_lea.vmem [#allocation5], %s604_s9  ;;  %s443_s4 = scalar_lea.sflag [#allocation4], %s917_s28 }
  0x45   : > { %661 = vset.pattern.permute.xlu0 %v797_v0  ;;  %v350_v2 = vld [vmem:[%s1180_s1] sm:$0xff]  ;;  %v261_v7 = vld [vmem:[%s923_s30 + $0x18] sm:$0xff]  ;;  %v264_v12 = vld [vmem:[%s923_s30 + $0x30] sm:$0xff]  ;;  %s450_s5 = smul.u32 (%p866_p9), 43, %s786_s15 }
  0x46   : > { %304 = vperm.xlu0 %661, %v301_v1   ;;  %v258_v4 = vld [vmem:[%s923_s30] sm:$0xff]  ;;  %v259_v5 = vld [vmem:[%s923_s30 + $0x8] sm:$0xff]  ;;  %v265_v16 = vld [vmem:[%s923_s30 + $0x38] sm:$0xff] }
  0x47   : > { %v262_v9 = vld [vmem:[%s923_s30 + $0x20] sm:$0xff]  ;;  %v263_v10 = vld [vmem:[%s923_s30 + $0x28] sm:$0xff]  ;;  %v268_v27 = vld [vmem:[%s923_s30 + $0x50] sm:$0xff]  ;;  %s451_s6 = ssub.s32 (%p866_p9), 44, %s450_s5 }
  0x48   : > { %v266_v19 = vld [vmem:[%s923_s30 + $0x40] sm:$0xff]  ;;  %v267_v24 = vld [vmem:[%s923_s30 + $0x48] sm:$0xff]  ;;  %v269_v30 = vld [vmem:[%s923_s30 + $0x58] sm:$0xff]  ;;  %p452_p8 = scmp.lt.s32.totalorder (%p866_p9), %s451_s6, 43 }
  0x49   : > { %v270_v33 = vld [vmem:[%s923_s30 + $0x60] sm:$0xff]  ;;  %v271_v36 = vld [vmem:[%s923_s30 + $0x68] sm:$0xff]  ;;  %v272_v39 = vld [vmem:[%s923_s30 + $0x70] sm:$0xff] }
  0x4a   : > { %v273_v42 = vld [vmem:[%s923_s30 + $0x78] sm:$0xff]  ;;  %v274_v45 = vld [vmem:[%s923_s30 + $0x80] sm:$0xff]  ;;  %v275_v48 = vld [vmem:[%s923_s30 + $0x88] sm:$0xff] }
  0x4b   : > { %v276_v51 = vld [vmem:[%s923_s30 + $0x90] sm:$0xff]  ;;  %v277_v54 = vld [vmem:[%s923_s30 + $0x98] sm:$0xff]  ;;  %v278_v57 = vld [vmem:[%s923_s30 + $0xa0] sm:$0xff] }
  0x4c   : > { %v279_v60 = vld [vmem:[%s923_s30 + $0xa8] sm:$0xff]  ;;  %v280_v63 = vld [vmem:[%s923_s30 + $0xb0] sm:$0xff] }
  0x4e   : > { %353 = vperm.xlu0 %661, %v350_v2   ;;  %v281_v2 = vld [vmem:[%s923_s30 + $0xb8] sm:$0xff] }
  0xb8   : > { %v935_v3 = vpop.permute.xlu0 %304 }
  0xb9   : > { %v307_v11 = vmul.f32 %v935_v3, %v258_v4  ;;  %v308_v13 = vmul.f32 %v935_v3, %v259_v5  ;;  %v309_v14 = vmul.f32 %v935_v3, %v260_v6  ;;  %v310_v15 = vmul.f32 %v935_v3, %v261_v7  ;;  %v282_v6 = vld [vmem:[%s923_s30 + $0xc0] sm:$0xff] }
  0xba   : > { %v311_v17 = vmul.f32 %v935_v3, %v262_v9  ;;  %v312_v20 = vmul.f32 %v935_v3, %v263_v10  ;;  %v313_v25 = vmul.f32 %v935_v3, %v264_v12  ;;  %v314_v28 = vmul.f32 %v935_v3, %v265_v16  ;;  %v283_v10 = vld [vmem:[%s923_s30 + $0xc8] sm:$0xff]  ;;  %v285_v16 = vld [vmem:[%s923_s30 + $0xd8] sm:$0xff] }
  0xbb   : > { %v315_v31 = vmul.f32 %v935_v3, %v266_v19  ;;  %v316_v34 = vmul.f32 %v935_v3, %v267_v24  ;;  %v317_v37 = vmul.f32 %v935_v3, %v268_v27  ;;  %v318_v40 = vmul.f32 %v935_v3, %v269_v30  ;;  %v286_v19 = vld [vmem:[%s923_s30 + $0xe0] sm:$0xff] }
  0xbc   : > { %v319_v43 = vmul.f32 %v935_v3, %v270_v33  ;;  %v320_v46 = vmul.f32 %v935_v3, %v271_v36  ;;  %v321_v49 = vmul.f32 %v935_v3, %v272_v39  ;;  %v322_v52 = vmul.f32 %v935_v3, %v273_v42 }
  0xbd   : > { %v323_v55 = vmul.f32 %v935_v3, %v274_v45  ;;  %v324_v58 = vmul.f32 %v935_v3, %v275_v48  ;;  %v325_v61 = vmul.f32 %v935_v3, %v276_v51  ;;  %v326_v0 = vmul.f32 %v935_v3, %v277_v54 }
  0xbe   : > { %v327_v4 = vmul.f32 %v935_v3, %v278_v57  ;;  %v328_v7 = vmul.f32 %v935_v3, %v279_v60 }
  0xc0   : > { %v941_v8 = vpop.permute.xlu0 %353 }
  0xc1   : > { %v356_v18 = vadd.f32 %v941_v8, %v307_v11  ;;  %v357_v21 = vadd.f32 %v941_v8, %v308_v13  ;;  %v358_v22 = vadd.f32 %v941_v8, %v309_v14  ;;  %v359_v23 = vadd.f32 %v941_v8, %v310_v15  ;;  %v284_v13 = vld [vmem:[%s923_s30 + $0xd0] sm:$0xff] }
  0xc2   : > { %v360_v26 = vadd.f32 %v941_v8, %v311_v17  ;;  %v361_v29 = vadd.f32 %v941_v8, %v312_v20  ;;  %v362_v32 = vadd.f32 %v941_v8, %v313_v25  ;;  %v363_v35 = vadd.f32 %v941_v8, %v314_v28  ;;  %v288_v25 = vld [vmem:[%s923_s30 + $0xf0] sm:$0xff]  ;;  %v289_v28 = vld [vmem:[%s923_s30 + $0xf8] sm:$0xff] }
  0xc3   : > { %399 = vst [vmem:[%s963_s23] sm:$0xff] %v356_v18  ;;  %v364_v38 = vadd.f32 %v941_v8, %v315_v31  ;;  %v365_v41 = vadd.f32 %v941_v8, %v316_v34  ;;  %v366_v44 = vadd.f32 %v941_v8, %v317_v37  ;;  %v367_v47 = vadd.f32 %v941_v8, %v318_v40  ;;  %v290_v31 = vld [vmem:[%s923_s30 + $0x100] sm:$0xff]  ;;  %v291_v34 = vld [vmem:[%s923_s30 + $0x108] sm:$0xff]  ;;  %v292_v37 = vld [vmem:[%s923_s30 + $0x110] sm:$0xff] }
  0xc4   : > { %400 = vst [vmem:[%s963_s23 + $0x8] sm:$0xff] %v357_v21  ;;  %v368_v50 = vadd.f32 %v941_v8, %v319_v43  ;;  %v369_v53 = vadd.f32 %v941_v8, %v320_v46  ;;  %v370_v56 = vadd.f32 %v941_v8, %v321_v49  ;;  %v371_v59 = vadd.f32 %v941_v8, %v322_v52  ;;  %v293_v40 = vld [vmem:[%s923_s30 + $0x118] sm:$0xff]  ;;  %v294_v43 = vld [vmem:[%s923_s30 + $0x120] sm:$0xff]  ;;  %v295_v46 = vld [vmem:[%s923_s30 + $0x128] sm:$0xff] }
  0xc5   : > { %401 = vst [vmem:[%s963_s23 + $0x10] sm:$0xff] %v358_v22  ;;  %v372_v62 = vadd.f32 %v941_v8, %v323_v55  ;;  %v373_v1 = vadd.f32 %v941_v8, %v324_v58  ;;  %v374_v5 = vadd.f32 %v941_v8, %v325_v61  ;;  %v375_v9 = vadd.f32 %v941_v8, %v326_v0  ;;  %v287_v22 = vld [vmem:[%s923_s30 + $0xe8] sm:$0xff]  ;;  %v296_v49 = vld [vmem:[%s923_s30 + $0x130] sm:$0xff]  ;;  %v297_v52 = vld [vmem:[%s923_s30 + $0x138] sm:$0xff] }
  0xc6   : > { %402 = vst [vmem:[%s963_s23 + $0x18] sm:$0xff] %v359_v23  ;;  %v329_v11 = vmul.f32 %v935_v3, %v280_v63  ;;  %v376_v12 = vadd.f32 %v941_v8, %v327_v4  ;;  %v330_v14 = vmul.f32 %v935_v3, %v281_v2  ;;  %v377_v15 = vadd.f32 %v941_v8, %v328_v7  ;;  %v298_v55 = vld [vmem:[%s923_s30 + $0x140] sm:$0xff]  ;;  %v299_v58 = vld [vmem:[%s923_s30 + $0x148] sm:$0xff]  ;;  %v300_v61 = vld [vmem:[%s923_s30 + $0x150] sm:$0xff] }
  0xc7   : > { %403 = vst [vmem:[%s963_s23 + $0x20] sm:$0xff] %v360_v26  ;;  %v331_v17 = vmul.f32 %v935_v3, %v282_v6  ;;  %v332_v20 = vmul.f32 %v935_v3, %v283_v10  ;;  %v333_v23 = vmul.f32 %v935_v3, %v284_v13  ;;  %v334_v26 = vmul.f32 %v935_v3, %v285_v16 }
  0xc8   : > { %404 = vst [vmem:[%s963_s23 + $0x28] sm:$0xff] %v361_v29  ;;  %v378_v18 = vadd.f32 %v941_v8, %v329_v11  ;;  %v379_v21 = vadd.f32 %v941_v8, %v330_v14  ;;  %v335_v29 = vmul.f32 %v935_v3, %v286_v19  ;;  %v347_v0 = vmul.f32 %v935_v3, %v298_v55 }
  0xc9   : > { %405 = vst [vmem:[%s963_s23 + $0x30] sm:$0xff] %v362_v32  ;;  %v380_v24 = vadd.f32 %v941_v8, %v331_v17  ;;  %v381_v27 = vadd.f32 %v941_v8, %v332_v20  ;;  %v382_v30 = vadd.f32 %v941_v8, %v333_v23  ;;  %v336_v32 = vmul.f32 %v935_v3, %v287_v22 }
  0xca   : > { %406 = vst [vmem:[%s963_s23 + $0x38] sm:$0xff] %v363_v35  ;;  %v383_v33 = vadd.f32 %v941_v8, %v334_v26  ;;  %v337_v35 = vmul.f32 %v935_v3, %v288_v25  ;;  %v384_v36 = vadd.f32 %v941_v8, %v335_v29  ;;  %v348_v2 = vmul.f32 %v935_v3, %v299_v58 }
  0xcb   : > { %407 = vst [vmem:[%s963_s23 + $0x40] sm:$0xff] %v364_v38  ;;  %v338_v38 = vmul.f32 %v935_v3, %v289_v28  ;;  %v385_v39 = vadd.f32 %v941_v8, %v336_v32  ;;  %v396_v6 = vadd.f32 %v941_v8, %v347_v0 }
  0xcc   : > { %408 = vst [vmem:[%s963_s23 + $0x48] sm:$0xff] %v365_v41  ;;  %v339_v41 = vmul.f32 %v935_v3, %v290_v31  ;;  %v386_v42 = vadd.f32 %v941_v8, %v337_v35  ;;  %v397_v7 = vadd.f32 %v941_v8, %v348_v2 }
  0xcd   : > { %409 = vst [vmem:[%s963_s23 + $0x50] sm:$0xff] %v366_v44  ;;  %v340_v44 = vmul.f32 %v935_v3, %v291_v34  ;;  %v387_v45 = vadd.f32 %v941_v8, %v338_v38 }
  0xce   : > { %410 = vst [vmem:[%s963_s23 + $0x58] sm:$0xff] %v367_v47  ;;  %v341_v47 = vmul.f32 %v935_v3, %v292_v37  ;;  %v388_v48 = vadd.f32 %v941_v8, %v339_v41 }
  0xcf   : > { %411 = vst [vmem:[%s963_s23 + $0x60] sm:$0xff] %v368_v50  ;;  %v342_v50 = vmul.f32 %v935_v3, %v293_v40  ;;  %v389_v51 = vadd.f32 %v941_v8, %v340_v44 }
  0xd0   : > { %412 = vst [vmem:[%s963_s23 + $0x68] sm:$0xff] %v369_v53  ;;  %v343_v53 = vmul.f32 %v935_v3, %v294_v43  ;;  %v390_v54 = vadd.f32 %v941_v8, %v341_v47 }
  0xd1   : > { %413 = vst [vmem:[%s963_s23 + $0x70] sm:$0xff] %v370_v56  ;;  %v344_v56 = vmul.f32 %v935_v3, %v295_v46  ;;  %v391_v57 = vadd.f32 %v941_v8, %v342_v50 }
  0xd2   : > { %414 = vst [vmem:[%s963_s23 + $0x78] sm:$0xff] %v371_v59  ;;  %v345_v59 = vmul.f32 %v935_v3, %v296_v49  ;;  %v392_v60 = vadd.f32 %v941_v8, %v343_v53 }
  0xd3   : > { %415 = vst [vmem:[%s963_s23 + $0x80] sm:$0xff] %v372_v62  ;;  %v346_v62 = vmul.f32 %v935_v3, %v297_v52  ;;  %v393_v63 = vadd.f32 %v941_v8, %v344_v56 }
  0xd4   : > { %416 = vst [vmem:[%s963_s23 + $0x88] sm:$0xff] %v373_v1  ;;  %v394_v1 = vadd.f32 %v941_v8, %v345_v59 }
  0xd5   : > { %417 = vst [vmem:[%s963_s23 + $0x90] sm:$0xff] %v374_v5  ;;  %v395_v4 = vadd.f32 %v941_v8, %v346_v62  ;;  %v349_v5 = vmul.f32 %v935_v3, %v300_v61 }
  0xd6   : > { %418 = vst [vmem:[%s963_s23 + $0x98] sm:$0xff] %v375_v9 }
  0xd7   : > { %419 = vst [vmem:[%s963_s23 + $0xa0] sm:$0xff] %v376_v12  ;;  %v398_v9 = vadd.f32 %v941_v8, %v349_v5 }
  0xd8   : > { %420 = vst [vmem:[%s963_s23 + $0xa8] sm:$0xff] %v377_v15 }
  0xd9   : > { %421 = vst [vmem:[%s963_s23 + $0xb0] sm:$0xff] %v378_v18 }
  0xda   : > { %422 = vst [vmem:[%s963_s23 + $0xb8] sm:$0xff] %v379_v21 }
  0xdb   : > { %423 = vst [vmem:[%s963_s23 + $0xc0] sm:$0xff] %v380_v24 }
  0xdc   : > { %424 = vst [vmem:[%s963_s23 + $0xc8] sm:$0xff] %v381_v27 }
  0xdd   : > { %425 = vst [vmem:[%s963_s23 + $0xd0] sm:$0xff] %v382_v30 }
  0xde   : > { %426 = vst [vmem:[%s963_s23 + $0xd8] sm:$0xff] %v383_v33 }
  0xdf   : > { %427 = vst [vmem:[%s963_s23 + $0xe0] sm:$0xff] %v384_v36 }
  0xe0   : > { %428 = vst [vmem:[%s963_s23 + $0xe8] sm:$0xff] %v385_v39 }
  0xe1   : > { %429 = vst [vmem:[%s963_s23 + $0xf0] sm:$0xff] %v386_v42 }
  0xe2   : > { %430 = vst [vmem:[%s963_s23 + $0xf8] sm:$0xff] %v387_v45 }
  0xe3   : > { %431 = vst [vmem:[%s963_s23 + $0x100] sm:$0xff] %v388_v48 }
  0xe4   : > { %432 = vst [vmem:[%s963_s23 + $0x108] sm:$0xff] %v389_v51 }
  0xe5   : > { %433 = vst [vmem:[%s963_s23 + $0x110] sm:$0xff] %v390_v54 }
  0xe6   : > { %434 = vst [vmem:[%s963_s23 + $0x118] sm:$0xff] %v391_v57 }
  0xe7   : > { %435 = vst [vmem:[%s963_s23 + $0x120] sm:$0xff] %v392_v60 }
  0xe8   : > { %436 = vst [vmem:[%s963_s23 + $0x128] sm:$0xff] %v393_v63 }
  0xe9   : > { %437 = vst [vmem:[%s963_s23 + $0x130] sm:$0xff] %v394_v1  ;;  %449 = sbr.rel (!%p866_p9) target bundleno = 268 (0x10c), region = 40 }
  0xea   : > { %438 = vst [vmem:[%s963_s23 + $0x138] sm:$0xff] %v395_v4 }
  0xeb   : > { %439 = vst [vmem:[%s963_s23 + $0x140] sm:$0xff] %v396_v6 }
  0xec   : > { %440 = vst [vmem:[%s963_s23 + $0x148] sm:$0xff] %v397_v7 }
  0xed   : > { %441 = vst [vmem:[%s963_s23 + $0x150] sm:$0xff] %v398_v9 }
  0xee   : > { %s1198_s6 = smov (!%p452_p8, %s451_s6), 43 }
  0xef   : > { %s594_s8 = sshll.u32 %s1198_s6, 3 }
  0xf0   : > { %s455_s10 = ssub.s32 344, %s594_s8 }
  0xf1   : > { %s456_s19 = sshll.u32 %s455_s10, 4 }
  0xf2   : > { %457 = vsyncadd %s443_s4, %s456_s19  ;;  %p1124_p0 = scmp.ne.s32.totalorder %s594_s8, 0  ;;  %s602_s21 = smul.u32 344, %s786_s15 }
  0xf3   : > { %s598_s22 = sshll.u32 %s1198_s6, 7  ;;  %s465_s9 = sshll.u32 %s963_s23, 4  ;;  %s1134_s9 = int_to_ptr.vmem [resolvable:$true] %s465_s9 }
  0xf4   : > { %s462_s7 = scalar_lea.hbm %s1182_s3, %s602_s21  ;;  %s701_s18 = sshra.s32 %s1134_s9, 4  ;;  %s702_s18 = int_to_ptr.vmem [resolvable:$true] %s701_s18 }
  0xf5   : > { %s467_s11 = sshll.u32 %s462_s7, 4  ;;  %s703_s27 = sshrl.u32 %s598_s22, 4  ;;  %s468_s11 = int_to_ptr.hbm [resolvable:$true] %s467_s11 }
  0xf6   : > { %s708_s5 = scalar_lea.vmem %s702_s18, %s703_s27  ;;  %s798_s15 = smov [#allocation5]  }
  0xf7   : > { %p709_p9 = scmp.ne.s32.totalorder %s702_s18, %s708_s5  ;;  %s712_s23 = scalar_lea.vmem %s798_s15, 688 }
  0xf8   : > { %p714_p7 = scmp.lt.s32.totalorder %s712_s23, %s708_s5 }
  0xf9   : > { %p710_p5 = pnand %p709_p9, %p1124_p0 }
  0xfb   : > { %p711_p6 = pneg %p710_p5 }
  0xfd   : > { %p716_p10 = pnand %p714_p7, %p711_p6 }
  0xff   : > { %719 = shalt.err (!%p716_p10)
}
 0x100   : > { %s720_s8 = sshra.s32 %s468_s11, 4  ;;  %s731_s29 = scalar_lea.hbm %s1182_s3, 352  ;;  %s721_s8 = int_to_ptr.hbm [resolvable:$true] %s720_s8 }
 0x101   : > { %s727_s10 = scalar_lea.hbm %s721_s8, %s703_s27  ;;  %p732_p3 = scmp.lt.s32.totalorder %s721_s8, %s1182_s3 }
 0x102   : > { %p728_p13 = scmp.ne.s32.totalorder %s721_s8, %s727_s10  ;;  %p733_p4 = scmp.lt.s32.totalorder %s731_s29, %s727_s10 }
 0x104   : > { %p729_p1 = pnand %p728_p13, %p1124_p0  ;;  %p734_p8 = por %p733_p4, %p732_p3 }
 0x106   : > { %p730_p2 = pneg %p729_p1 }
 0x108   : > { %p735_p9 = pnand %p734_p8, %p730_p2 }
 0x10a   : > { %738 = shalt.err (!%p735_p9)
}
 0x10b   : > { %470 = dma.vmem_to_hbm [thread:$0]  (%p1124_p0), %s1134_s9, %s598_s22, %s468_s11, %s443_s4  }
 0x10c PF: > { %s479_s18 = sand.u32 1, %s774_s12   ;;  %p608_p5 = pnand %p587_p12, %p873_p11 }
 0x10d   : > { %s480_s27 = scalar_lea.sflag [#allocation4], %s479_s18 }
 0x10e   : > { %p609_p6 = pneg %p608_p5 }
 0x110   : > { %769 = dma.done.wait (%p609_p6), %s480_s27, 5504  }
 0x111   : > { %771 = vsyncadd (%p609_p6), %s480_s27, 4294961792  ;;  %s19_s17 = sadd.s32 1, %s794_s17   ;;  %s1188_s12 = smov %s778_s13 }
 0x112   : > { %p16_p7 = scmp.ge.s32.totalorder %s19_s17, 4   ;;  %s1189_s13 = smov %s782_s14 }
 0x113   : > { %s1190_s14 = smov %s871_s25  ;;  %s1191_s15 = smov %s790_s16 }
 0x114   : > { %s1192_s16 = smov %s1194_s20  ;;  %18 = sbr.rel (!%p16_p7) target bundleno = 6 (0x6), region = 83 }
 0x119   :  { %486 = vsyncpa [#allocation3], 1 }
 0x11a   :  { %488 = vsyncpa [#allocation3 + $0x1], 1 }
 0x11b   :  { %489 = vsyncpa [#allocation4], 1 }
 0x11c   :  { %491 = vsyncpa [#allocation4 + $0x1], 1 }

</bundles_post_ra>
